<compile_context>
chip_gen: v6e
topology: v6e:2x2x1
jax: 0.10.0
libtpu: 0.0.40
codegen_flags: <defaults>
</compile_context>

<pallas_src>
import functools

import jax
import jax.numpy as jnp
from jax.experimental import pallas as pl
from jax.experimental.pallas import tpu as pltpu


# ----------------------------------------------------------------------------
# Fused kernel: one batch element per grid step, all heads per step.
#   xq: (1, Lq, E)   xk/xv: (1, Lk, E)
#   wq/wk/wv: (E, A) bq/bk/bv: (1, A)   wp: (A, E) bp: (1, E)
#   out: (1, Lq, E)
# ----------------------------------------------------------------------------
def _fused_attention_kernel(xq_ref, xk_ref, xv_ref,
                            wq_ref, bq_ref, wk_ref, bk_ref, wv_ref, bv_ref,
                            wp_ref, bp_ref, o_ref, *, num_heads, scale):
    x_dtype = xq_ref.dtype
    xq = xq_ref[0]                      # (Lq, E)
    xk = xk_ref[0]                      # (Lk, E)
    xv = xv_ref[0]                      # (Lk, E)

    # --- fused QKV projections (MXU, f32 accumulation) ------------------------
    q = jnp.dot(xq, wq_ref[...], preferred_element_type=jnp.float32) + bq_ref[...]
    k = jnp.dot(xk, wk_ref[...], preferred_element_type=jnp.float32) + bk_ref[...]
    v = jnp.dot(xv, wv_ref[...], preferred_element_type=jnp.float32) + bv_ref[...]

    # Fold the softmax scale into q (Lq*A elements) instead of the score matrix.
    # Casting back to the input dtype keeps the MXU on the native (e.g. bf16)
    # path when inputs are low precision; it is a no-op for f32 inputs.
    q = (q * scale).astype(x_dtype)
    k = k.astype(x_dtype)
    v = v.astype(x_dtype)

    Lq, A = q.shape
    hd = A // num_heads

    # --- per-head scaled-dot-product attention (static unroll over heads) -----
    # The head split is a static lane slice of the VMEM-resident projections;
    # nothing is written back to HBM between projection and attention.
    head_outs = []
    for h in range(num_heads):
        qh = q[:, h * hd:(h + 1) * hd]          # (Lq, hd)
        kh = k[:, h * hd:(h + 1) * hd]          # (Lk, hd)
        vh = v[:, h * hd:(h + 1) * hd]          # (Lk, hd)

        # q @ k^T expressed as a contraction on the minor dim of both operands,
        # so Mosaic feeds K directly (no explicit transpose of the K tile).
        s = jax.lax.dot_general(qh, kh, (((1,), (1,)), ((), ())),
                                preferred_element_type=jnp.float32)  # (Lq, Lk)

        m = jnp.max(s, axis=-1, keepdims=True)
        p = jnp.exp(s - m)                      # unnormalized probabilities
        l = jnp.sum(p, axis=-1, keepdims=True)  # (Lq, 1)

        # TODO(synk): attention_dropout (train mode) not implemented (eval = id).
        oh = jnp.dot(p.astype(x_dtype), vh,
                     preferred_element_type=jnp.float32)             # (Lq, hd)

        # Normalize the (Lq, hd) output via reciprocal+multiply instead of a
        # divide over the (Lq, Lk) score matrix.  (approx=True would push this
        # onto the otherwise-idle EUP slot; kept exact to hold the 1e-4 test
        # tolerance against the pure-JAX reference.)
        oh = oh * pl.reciprocal(l, approx=False)
        head_outs.append(oh)

    # Head-major concatenation along lanes == the torch reshape back to E.
    o = jnp.concatenate(head_outs, axis=-1).astype(x_dtype)          # (Lq, A)

    # --- output projection fused into the epilogue (no HBM round-trip) --------
    out = jnp.dot(o, wp_ref[...], preferred_element_type=jnp.float32) + bp_ref[...]
    # TODO(synk): proj dropout (train mode) not implemented (eval = identity).
    o_ref[0] = out.astype(o_ref.dtype)


# ----------------------------------------------------------------------------
# Module wrapper
# ----------------------------------------------------------------------------
def init_attention_params(key, embed_dim, num_heads, dtype=jnp.float32):
    head_dim = embed_dim // num_heads
    all_head_dim = head_dim * num_heads
    ks = jax.random.split(key, 8)
    bound_e = 1.0 / (embed_dim ** 0.5)
    bound_a = 1.0 / (all_head_dim ** 0.5)

    def u(k, shape, bound):
        return jax.random.uniform(k, shape, dtype, minval=-bound, maxval=bound)

    return {
        # weights stored as (in, out) so forward is x @ W + b
        "wq": u(ks[0], (embed_dim, all_head_dim), bound_e),
        "bq": u(ks[1], (all_head_dim,), bound_e),
        "wk": u(ks[2], (embed_dim, all_head_dim), bound_e),
        "bk": u(ks[3], (all_head_dim,), bound_e),
        "wv": u(ks[4], (embed_dim, all_head_dim), bound_e),
        "bv": u(ks[5], (all_head_dim,), bound_e),
        "wp": u(ks[6], (all_head_dim, embed_dim), bound_a),
        "bp": u(ks[7], (embed_dim,), bound_a),
    }


def attention_forward(params, query, key, value, num_heads):
    """query/key/value: (L, B, E) seq-first, matching the PyTorch module."""
    Lq, B, E = query.shape
    Lk = key.shape[0]
    hd = E // num_heads
    A = num_heads * hd
    scale = float(hd) ** -0.5

    # Layout plumbing only (raw inputs, tiny): seq-first -> batch-major so each
    # grid step addresses a full-dim (Lq, E) / (Lk, E) slab via the index_map.
    # No head-split (B*H, L, hd) transpose is ever materialized.
    qb = jnp.transpose(query, (1, 0, 2))   # (B, Lq, E)
    kb = jnp.transpose(key, (1, 0, 2))     # (B, Lk, E)
    vb = jnp.transpose(value, (1, 0, 2))   # (B, Lk, E)

    bq = params["bq"].reshape(1, A)
    bk = params["bk"].reshape(1, A)
    bv = params["bv"].reshape(1, A)
    bp = params["bp"].reshape(1, E)

    # Advisory cost estimate for XLA's scheduler.
    itemsize = jnp.dtype(query.dtype).itemsize
    flops = 2 * B * (Lq * E * A + 2 * Lk * E * A + 2 * Lq * Lk * A + Lq * A * E)
    transcendentals = B * num_heads * Lq * Lk
    bytes_accessed = itemsize * (2 * B * Lq * E + 2 * B * Lk * E
                                 + 3 * E * A + A * E + 3 * A + E)

    kernel = functools.partial(_fused_attention_kernel,
                               num_heads=num_heads, scale=scale)

    out_b = pl.pallas_call(
        kernel,
        out_shape=jax.ShapeDtypeStruct((B, Lq, E), query.dtype),
        grid=(B,),
        in_specs=[
            pl.BlockSpec((1, Lq, E), lambda b: (b, 0, 0)),   # query slab
            pl.BlockSpec((1, Lk, E), lambda b: (b, 0, 0)),   # key slab
            pl.BlockSpec((1, Lk, E), lambda b: (b, 0, 0)),   # value slab
            pl.BlockSpec((E, A), lambda b: (0, 0)),          # wq (VMEM-resident)
            pl.BlockSpec((1, A), lambda b: (0, 0)),          # bq
            pl.BlockSpec((E, A), lambda b: (0, 0)),          # wk
            pl.BlockSpec((1, A), lambda b: (0, 0)),          # bk
            pl.BlockSpec((E, A), lambda b: (0, 0)),          # wv
            pl.BlockSpec((1, A), lambda b: (0, 0)),          # bv
            pl.BlockSpec((A, E), lambda b: (0, 0)),          # wp
            pl.BlockSpec((1, E), lambda b: (0, 0)),          # bp
        ],
        out_specs=pl.BlockSpec((1, Lq, E), lambda b: (b, 0, 0)),
        compiler_params=pltpu.CompilerParams(
            dimension_semantics=("parallel",)),
        cost_estimate=pl.CostEstimate(
            flops=int(flops),
            transcendentals=int(transcendentals),
            bytes_accessed=int(bytes_accessed)),
    )(qb, kb, vb,
      params["wq"], bq, params["wk"], bk, params["wv"], bv,
      params["wp"], bp)

    return jnp.transpose(out_b, (1, 0, 2))   # back to (Lq, B, E)


# ----------------------------------------------------------------------------
# Pure-JAX reference for correctness checking (mirrors the PyTorch forward)
# ----------------------------------------------------------------------------
def attention_reference(params, query, key, value, num_heads):
    Lq, B, E = query.shape
    Lk = key.shape[0]
    hd = E // num_heads
    scale = float(hd) ** -0.5
    q = query @ params["wq"] + params["bq"]
    k = key @ params["wk"] + params["bk"]
    v = value @ params["wv"] + params["bv"]

    def heads(x, L):
        return x.reshape(L, B, num_heads, hd).transpose(1, 2, 0, 3).reshape(
            B * num_heads, L, hd)

    qh, kh, vh = heads(q, Lq), heads(k, Lk), heads(v, Lk)
    attn = jnp.einsum("bqd,bkd->bqk", qh, kh) * scale
    attn = jax.nn.softmax(attn, axis=-1)
    o = jnp.einsum("bqk,bkd->bqd", attn, vh)
    o = o.reshape(B, num_heads, Lq, hd).transpose(2, 0, 1, 3).reshape(Lq, B, E)
    return o @ params["wp"] + params["bp"]


if __name__ == "__main__":
    embed_dim = 32
    num_heads = 4
    seq_len = 8     # query_len == key_len == 8
    batch = 2

    root = jax.random.PRNGKey(0)
    kq, kk, kv, kp = jax.random.split(root, 4)

    query = jax.random.normal(kq, (seq_len, batch, embed_dim), jnp.float32)
    key_ = jax.random.normal(kk, (seq_len, batch, embed_dim), jnp.float32)
    value = jax.random.normal(kv, (seq_len, batch, embed_dim), jnp.float32)

    params = init_attention_params(kp, embed_dim, num_heads)

    out = attention_forward(params, query, key_, value, num_heads)
    out = jax.block_until_ready(out)

    ref = attention_reference(params, query, key_, value, num_heads)
    assert out.shape == (seq_len, batch, embed_dim)
    assert jnp.allclose(out, ref, atol=1e-4, rtol=1e-4), "mismatch vs reference"

    print("KERNEL_OK")
</pallas_src>

<mosaic_0001>
module attributes {stable_mosaic.version = 11 : i64} {
  func.func @_fused_attention_kernel(%arg0: i32, %arg1: memref<1x8x32xf32, #tpu.memory_space<vmem>>, %arg2: memref<1x8x32xf32, #tpu.memory_space<vmem>>, %arg3: memref<1x8x32xf32, #tpu.memory_space<vmem>>, %arg4: memref<32x32xf32, #tpu.memory_space<vmem>>, %arg5: memref<1x32xf32, #tpu.memory_space<vmem>>, %arg6: memref<32x32xf32, #tpu.memory_space<vmem>>, %arg7: memref<1x32xf32, #tpu.memory_space<vmem>>, %arg8: memref<32x32xf32, #tpu.memory_space<vmem>>, %arg9: memref<1x32xf32, #tpu.memory_space<vmem>>, %arg10: memref<32x32xf32, #tpu.memory_space<vmem>>, %arg11: memref<1x32xf32, #tpu.memory_space<vmem>>, %arg12: memref<1x8x32xf32, #tpu.memory_space<vmem>>) attributes {dimension_semantics = [#tpu.dimension_semantics<parallel>], iteration_bounds = array<i64: 2>, scalar_prefetch = 0 : i64, scratch_operands = 0 : i64, tpu.core_type = #tpu.core_type<tc>, window_params = [{transform_indices = @transform_0, window_bounds = array<i64: 1, 8, 32>}, {transform_indices = @transform_1, window_bounds = array<i64: 1, 8, 32>}, {transform_indices = @transform_2, window_bounds = array<i64: 1, 8, 32>}, {pipeline_mode = #tpu.pipeline_mode<synchronous>, transform_indices = @transform_3, window_bounds = array<i64: 32, 32>}, {pipeline_mode = #tpu.pipeline_mode<synchronous>, transform_indices = @transform_4, window_bounds = array<i64: 1, 32>}, {pipeline_mode = #tpu.pipeline_mode<synchronous>, transform_indices = @transform_5, window_bounds = array<i64: 32, 32>}, {pipeline_mode = #tpu.pipeline_mode<synchronous>, transform_indices = @transform_6, window_bounds = array<i64: 1, 32>}, {pipeline_mode = #tpu.pipeline_mode<synchronous>, transform_indices = @transform_7, window_bounds = array<i64: 32, 32>}, {pipeline_mode = #tpu.pipeline_mode<synchronous>, transform_indices = @transform_8, window_bounds = array<i64: 1, 32>}, {pipeline_mode = #tpu.pipeline_mode<synchronous>, transform_indices = @transform_9, window_bounds = array<i64: 32, 32>}, {pipeline_mode = #tpu.pipeline_mode<synchronous>, transform_indices = @transform_10, window_bounds = array<i64: 1, 32>}, {transform_indices = @transform_11, window_bounds = array<i64: 1, 8, 32>}]} {
    %c0 = arith.constant 0 : index
    %c0_0 = arith.constant 0 : index
    %c0_1 = arith.constant 0 : index
    %0 = vector.load %arg1[%c0, %c0_0, %c0_1] : memref<1x8x32xf32, #tpu.memory_space<vmem>>, vector<1x8x32xf32>
    %1 = vector.shape_cast %0 : vector<1x8x32xf32> to vector<8x32xf32>
    %c0_2 = arith.constant 0 : index
    %c0_3 = arith.constant 0 : index
    %c0_4 = arith.constant 0 : index
    %2 = vector.load %arg2[%c0_2, %c0_3, %c0_4] : memref<1x8x32xf32, #tpu.memory_space<vmem>>, vector<1x8x32xf32>
    %3 = vector.shape_cast %2 : vector<1x8x32xf32> to vector<8x32xf32>
    %c0_5 = arith.constant 0 : index
    %c0_6 = arith.constant 0 : index
    %c0_7 = arith.constant 0 : index
    %4 = vector.load %arg3[%c0_5, %c0_6, %c0_7] : memref<1x8x32xf32, #tpu.memory_space<vmem>>, vector<1x8x32xf32>
    %5 = vector.shape_cast %4 : vector<1x8x32xf32> to vector<8x32xf32>
    %c0_8 = arith.constant 0 : index
    %c0_9 = arith.constant 0 : index
    %6 = vector.load %arg4[%c0_8, %c0_9] : memref<32x32xf32, #tpu.memory_space<vmem>>, vector<32x32xf32>
    %cst = arith.constant dense<0.000000e+00> : vector<8x32xf32>
    %7 = tpu.matmul %1, %6, %cst {dimension_numbers = #tpu.dot_dimension_numbers<[1], [0], [0], [1], [0, 0, 1, 1], [], []>} : vector<8x32xf32>, vector<32x32xf32>, vector<8x32xf32> -> vector<8x32xf32>
    %c0_10 = arith.constant 0 : index
    %c0_11 = arith.constant 0 : index
    %8 = vector.load %arg5[%c0_10, %c0_11] : memref<1x32xf32, #tpu.memory_space<vmem>>, vector<1x32xf32>
    %9 = vector.broadcast %8 : vector<1x32xf32> to vector<8x32xf32>
    %10 = arith.addf %7, %9 : vector<8x32xf32>
    %c0_12 = arith.constant 0 : index
    %c0_13 = arith.constant 0 : index
    %11 = vector.load %arg6[%c0_12, %c0_13] : memref<32x32xf32, #tpu.memory_space<vmem>>, vector<32x32xf32>
    %cst_14 = arith.constant dense<0.000000e+00> : vector<8x32xf32>
    %12 = tpu.matmul %3, %11, %cst_14 {dimension_numbers = #tpu.dot_dimension_numbers<[1], [0], [0], [1], [0, 0, 1, 1], [], []>} : vector<8x32xf32>, vector<32x32xf32>, vector<8x32xf32> -> vector<8x32xf32>
    %c0_15 = arith.constant 0 : index
    %c0_16 = arith.constant 0 : index
    %13 = vector.load %arg7[%c0_15, %c0_16] : memref<1x32xf32, #tpu.memory_space<vmem>>, vector<1x32xf32>
    %14 = vector.broadcast %13 : vector<1x32xf32> to vector<8x32xf32>
    %15 = arith.addf %12, %14 : vector<8x32xf32>
    %c0_17 = arith.constant 0 : index
    %c0_18 = arith.constant 0 : index
    %16 = vector.load %arg8[%c0_17, %c0_18] : memref<32x32xf32, #tpu.memory_space<vmem>>, vector<32x32xf32>
    %cst_19 = arith.constant dense<0.000000e+00> : vector<8x32xf32>
    %17 = tpu.matmul %5, %16, %cst_19 {dimension_numbers = #tpu.dot_dimension_numbers<[1], [0], [0], [1], [0, 0, 1, 1], [], []>} : vector<8x32xf32>, vector<32x32xf32>, vector<8x32xf32> -> vector<8x32xf32>
    %c0_20 = arith.constant 0 : index
    %c0_21 = arith.constant 0 : index
    %18 = vector.load %arg9[%c0_20, %c0_21] : memref<1x32xf32, #tpu.memory_space<vmem>>, vector<1x32xf32>
    %19 = vector.broadcast %18 : vector<1x32xf32> to vector<8x32xf32>
    %20 = arith.addf %17, %19 : vector<8x32xf32>
    %cst_22 = arith.constant 0.353553385 : f32
    %21 = vector.broadcast %cst_22 : f32 to vector<8x32xf32>
    %22 = arith.mulf %10, %21 : vector<8x32xf32>
    %23 = vector.extract_strided_slice %22 {offsets = [0, 0], sizes = [8, 8], strides = [1, 1]} : vector<8x32xf32> to vector<8x8xf32>
    %24 = vector.extract_strided_slice %15 {offsets = [0, 0], sizes = [8, 8], strides = [1, 1]} : vector<8x32xf32> to vector<8x8xf32>
    %25 = vector.extract_strided_slice %20 {offsets = [0, 0], sizes = [8, 8], strides = [1, 1]} : vector<8x32xf32> to vector<8x8xf32>
    %cst_23 = arith.constant dense<0.000000e+00> : vector<8x8xf32>
    %26 = tpu.matmul %23, %24, %cst_23 {dimension_numbers = #tpu.dot_dimension_numbers<[1], [1], [0], [0], [0, 0, 1, 0], [], []>} : vector<8x8xf32>, vector<8x8xf32>, vector<8x8xf32> -> vector<8x8xf32>
    %cst_24 = arith.constant dense<0xFF800000> : vector<8xf32>
    %27 = vector.multi_reduction <maximumf>, %26, %cst_24 [1] : vector<8x8xf32> to vector<8xf32>
    %28 = vector.shape_cast %27 : vector<8xf32> to vector<8x1xf32>
    %29 = vector.broadcast %28 : vector<8x1xf32> to vector<8x8xf32>
    %30 = arith.subf %26, %29 : vector<8x8xf32>
    %31 = math.exp %30 : vector<8x8xf32>
    %cst_25 = arith.constant dense<0.000000e+00> : vector<8xf32>
    %32 = vector.multi_reduction <add>, %31, %cst_25 [1] : vector<8x8xf32> to vector<8xf32>
    %33 = vector.shape_cast %32 : vector<8xf32> to vector<8x1xf32>
    %cst_26 = arith.constant dense<0.000000e+00> : vector<8x8xf32>
    %34 = tpu.matmul %31, %25, %cst_26 {dimension_numbers = #tpu.dot_dimension_numbers<[1], [0], [0], [1], [0, 0, 1, 1], [], []>} : vector<8x8xf32>, vector<8x8xf32>, vector<8x8xf32> -> vector<8x8xf32>
    %35 = tpu.reciprocal %33 : vector<8x1xf32> -> vector<8x1xf32>
    %36 = vector.broadcast %35 : vector<8x1xf32> to vector<8x8xf32>
    %37 = arith.mulf %34, %36 : vector<8x8xf32>
    %38 = vector.extract_strided_slice %22 {offsets = [0, 8], sizes = [8, 8], strides = [1, 1]} : vector<8x32xf32> to vector<8x8xf32>
    %39 = vector.extract_strided_slice %15 {offsets = [0, 8], sizes = [8, 8], strides = [1, 1]} : vector<8x32xf32> to vector<8x8xf32>
    %40 = vector.extract_strided_slice %20 {offsets = [0, 8], sizes = [8, 8], strides = [1, 1]} : vector<8x32xf32> to vector<8x8xf32>
    %cst_27 = arith.constant dense<0.000000e+00> : vector<8x8xf32>
    %41 = tpu.matmul %38, %39, %cst_27 {dimension_numbers = #tpu.dot_dimension_numbers<[1], [1], [0], [0], [0, 0, 1, 0], [], []>} : vector<8x8xf32>, vector<8x8xf32>, vector<8x8xf32> -> vector<8x8xf32>
    %cst_28 = arith.constant dense<0xFF800000> : vector<8xf32>
    %42 = vector.multi_reduction <maximumf>, %41, %cst_28 [1] : vector<8x8xf32> to vector<8xf32>
    %43 = vector.shape_cast %42 : vector<8xf32> to vector<8x1xf32>
    %44 = vector.broadcast %43 : vector<8x1xf32> to vector<8x8xf32>
    %45 = arith.subf %41, %44 : vector<8x8xf32>
    %46 = math.exp %45 : vector<8x8xf32>
    %cst_29 = arith.constant dense<0.000000e+00> : vector<8xf32>
    %47 = vector.multi_reduction <add>, %46, %cst_29 [1] : vector<8x8xf32> to vector<8xf32>
    %48 = vector.shape_cast %47 : vector<8xf32> to vector<8x1xf32>
    %cst_30 = arith.constant dense<0.000000e+00> : vector<8x8xf32>
    %49 = tpu.matmul %46, %40, %cst_30 {dimension_numbers = #tpu.dot_dimension_numbers<[1], [0], [0], [1], [0, 0, 1, 1], [], []>} : vector<8x8xf32>, vector<8x8xf32>, vector<8x8xf32> -> vector<8x8xf32>
    %50 = tpu.reciprocal %48 : vector<8x1xf32> -> vector<8x1xf32>
    %51 = vector.broadcast %50 : vector<8x1xf32> to vector<8x8xf32>
    %52 = arith.mulf %49, %51 : vector<8x8xf32>
    %53 = vector.extract_strided_slice %22 {offsets = [0, 16], sizes = [8, 8], strides = [1, 1]} : vector<8x32xf32> to vector<8x8xf32>
    %54 = vector.extract_strided_slice %15 {offsets = [0, 16], sizes = [8, 8], strides = [1, 1]} : vector<8x32xf32> to vector<8x8xf32>
    %55 = vector.extract_strided_slice %20 {offsets = [0, 16], sizes = [8, 8], strides = [1, 1]} : vector<8x32xf32> to vector<8x8xf32>
    %cst_31 = arith.constant dense<0.000000e+00> : vector<8x8xf32>
    %56 = tpu.matmul %53, %54, %cst_31 {dimension_numbers = #tpu.dot_dimension_numbers<[1], [1], [0], [0], [0, 0, 1, 0], [], []>} : vector<8x8xf32>, vector<8x8xf32>, vector<8x8xf32> -> vector<8x8xf32>
    %cst_32 = arith.constant dense<0xFF800000> : vector<8xf32>
    %57 = vector.multi_reduction <maximumf>, %56, %cst_32 [1] : vector<8x8xf32> to vector<8xf32>
    %58 = vector.shape_cast %57 : vector<8xf32> to vector<8x1xf32>
    %59 = vector.broadcast %58 : vector<8x1xf32> to vector<8x8xf32>
    %60 = arith.subf %56, %59 : vector<8x8xf32>
    %61 = math.exp %60 : vector<8x8xf32>
    %cst_33 = arith.constant dense<0.000000e+00> : vector<8xf32>
    %62 = vector.multi_reduction <add>, %61, %cst_33 [1] : vector<8x8xf32> to vector<8xf32>
    %63 = vector.shape_cast %62 : vector<8xf32> to vector<8x1xf32>
    %cst_34 = arith.constant dense<0.000000e+00> : vector<8x8xf32>
    %64 = tpu.matmul %61, %55, %cst_34 {dimension_numbers = #tpu.dot_dimension_numbers<[1], [0], [0], [1], [0, 0, 1, 1], [], []>} : vector<8x8xf32>, vector<8x8xf32>, vector<8x8xf32> -> vector<8x8xf32>
    %65 = tpu.reciprocal %63 : vector<8x1xf32> -> vector<8x1xf32>
    %66 = vector.broadcast %65 : vector<8x1xf32> to vector<8x8xf32>
    %67 = arith.mulf %64, %66 : vector<8x8xf32>
    %68 = vector.extract_strided_slice %22 {offsets = [0, 24], sizes = [8, 8], strides = [1, 1]} : vector<8x32xf32> to vector<8x8xf32>
    %69 = vector.extract_strided_slice %15 {offsets = [0, 24], sizes = [8, 8], strides = [1, 1]} : vector<8x32xf32> to vector<8x8xf32>
    %70 = vector.extract_strided_slice %20 {offsets = [0, 24], sizes = [8, 8], strides = [1, 1]} : vector<8x32xf32> to vector<8x8xf32>
    %cst_35 = arith.constant dense<0.000000e+00> : vector<8x8xf32>
    %71 = tpu.matmul %68, %69, %cst_35 {dimension_numbers = #tpu.dot_dimension_numbers<[1], [1], [0], [0], [0, 0, 1, 0], [], []>} : vector<8x8xf32>, vector<8x8xf32>, vector<8x8xf32> -> vector<8x8xf32>
    %cst_36 = arith.constant dense<0xFF800000> : vector<8xf32>
    %72 = vector.multi_reduction <maximumf>, %71, %cst_36 [1] : vector<8x8xf32> to vector<8xf32>
    %73 = vector.shape_cast %72 : vector<8xf32> to vector<8x1xf32>
    %74 = vector.broadcast %73 : vector<8x1xf32> to vector<8x8xf32>
    %75 = arith.subf %71, %74 : vector<8x8xf32>
    %76 = math.exp %75 : vector<8x8xf32>
    %cst_37 = arith.constant dense<0.000000e+00> : vector<8xf32>
    %77 = vector.multi_reduction <add>, %76, %cst_37 [1] : vector<8x8xf32> to vector<8xf32>
    %78 = vector.shape_cast %77 : vector<8xf32> to vector<8x1xf32>
    %cst_38 = arith.constant dense<0.000000e+00> : vector<8x8xf32>
    %79 = tpu.matmul %76, %70, %cst_38 {dimension_numbers = #tpu.dot_dimension_numbers<[1], [0], [0], [1], [0, 0, 1, 1], [], []>} : vector<8x8xf32>, vector<8x8xf32>, vector<8x8xf32> -> vector<8x8xf32>
    %80 = tpu.reciprocal %78 : vector<8x1xf32> -> vector<8x1xf32>
    %81 = vector.broadcast %80 : vector<8x1xf32> to vector<8x8xf32>
    %82 = arith.mulf %79, %81 : vector<8x8xf32>
    %83 = tpu.concatenate %37, %52, %67, %82 in 1 : vector<8x8xf32>, vector<8x8xf32>, vector<8x8xf32>, vector<8x8xf32> -> vector<8x32xf32>
    %c0_39 = arith.constant 0 : index
    %c0_40 = arith.constant 0 : index
    %84 = vector.load %arg10[%c0_39, %c0_40] : memref<32x32xf32, #tpu.memory_space<vmem>>, vector<32x32xf32>
    %cst_41 = arith.constant dense<0.000000e+00> : vector<8x32xf32>
    %85 = tpu.matmul %83, %84, %cst_41 {dimension_numbers = #tpu.dot_dimension_numbers<[1], [0], [0], [1], [0, 0, 1, 1], [], []>} : vector<8x32xf32>, vector<32x32xf32>, vector<8x32xf32> -> vector<8x32xf32>
    %c0_42 = arith.constant 0 : index
    %c0_43 = arith.constant 0 : index
    %86 = vector.load %arg11[%c0_42, %c0_43] : memref<1x32xf32, #tpu.memory_space<vmem>>, vector<1x32xf32>
    %87 = vector.broadcast %86 : vector<1x32xf32> to vector<8x32xf32>
    %88 = arith.addf %85, %87 : vector<8x32xf32>
    %c0_44 = arith.constant 0 : index
    %c0_45 = arith.constant 0 : index
    %c0_46 = arith.constant 0 : index
    %89 = vector.load %arg12[%c0_44, %c0_45, %c0_46] : memref<1x8x32xf32, #tpu.memory_space<vmem>>, vector<1x8x32xf32>
    %90 = vector.shape_cast %89 : vector<1x8x32xf32> to vector<8x32xf32>
    %91 = vector.shape_cast %88 : vector<8x32xf32> to vector<1x8x32xf32>
    tpu.vector_store %arg12[%c0_44, %c0_45, %c0_46], %91 {strides = array<i32>} : memref<1x8x32xf32, #tpu.memory_space<vmem>>, vector<1x8x32xf32>,
    return
  }
  func.func @transform_0(%arg0: i32) -> (i32, i32, i32) {
    %c0_i32 = arith.constant 0 : i32
    %c0_i32_0 = arith.constant 0 : i32
    %c0_i32_1 = arith.constant 0 : i32
    return %arg0, %c0_i32, %c0_i32_0 : i32, i32, i32
  }
  func.func @transform_1(%arg0: i32) -> (i32, i32, i32) {
    %c0_i32 = arith.constant 0 : i32
    %c0_i32_0 = arith.constant 0 : i32
    %c0_i32_1 = arith.constant 0 : i32
    return %arg0, %c0_i32, %c0_i32_0 : i32, i32, i32
  }
  func.func @transform_2(%arg0: i32) -> (i32, i32, i32) {
    %c0_i32 = arith.constant 0 : i32
    %c0_i32_0 = arith.constant 0 : i32
    %c0_i32_1 = arith.constant 0 : i32
    return %arg0, %c0_i32, %c0_i32_0 : i32, i32, i32
  }
  func.func @transform_3(%arg0: i32) -> (i32, i32) {
    %c0_i32 = arith.constant 0 : i32
    %c0_i32_0 = arith.constant 0 : i32
    %c0_i32_1 = arith.constant 0 : i32
    return %c0_i32, %c0_i32_0 : i32, i32
  }
  func.func @transform_4(%arg0: i32) -> (i32, i32) {
    %c0_i32 = arith.constant 0 : i32
    %c0_i32_0 = arith.constant 0 : i32
    %c0_i32_1 = arith.constant 0 : i32
    return %c0_i32, %c0_i32_0 : i32, i32
  }
  func.func @transform_5(%arg0: i32) -> (i32, i32) {
    %c0_i32 = arith.constant 0 : i32
    %c0_i32_0 = arith.constant 0 : i32
    %c0_i32_1 = arith.constant 0 : i32
    return %c0_i32, %c0_i32_0 : i32, i32
  }
  func.func @transform_6(%arg0: i32) -> (i32, i32) {
    %c0_i32 = arith.constant 0 : i32
    %c0_i32_0 = arith.constant 0 : i32
    %c0_i32_1 = arith.constant 0 : i32
    return %c0_i32, %c0_i32_0 : i32, i32
  }
  func.func @transform_7(%arg0: i32) -> (i32, i32) {
    %c0_i32 = arith.constant 0 : i32
    %c0_i32_0 = arith.constant 0 : i32
    %c0_i32_1 = arith.constant 0 : i32
    return %c0_i32, %c0_i32_0 : i32, i32
  }
  func.func @transform_8(%arg0: i32) -> (i32, i32) {
    %c0_i32 = arith.constant 0 : i32
    %c0_i32_0 = arith.constant 0 : i32
    %c0_i32_1 = arith.constant 0 : i32
    return %c0_i32, %c0_i32_0 : i32, i32
  }
  func.func @transform_9(%arg0: i32) -> (i32, i32) {
    %c0_i32 = arith.constant 0 : i32
    %c0_i32_0 = arith.constant 0 : i32
    %c0_i32_1 = arith.constant 0 : i32
    return %c0_i32, %c0_i32_0 : i32, i32
  }
  func.func @transform_10(%arg0: i32) -> (i32, i32) {
    %c0_i32 = arith.constant 0 : i32
    %c0_i32_0 = arith.constant 0 : i32
    %c0_i32_1 = arith.constant 0 : i32
    return %c0_i32, %c0_i32_0 : i32, i32
  }
  func.func @transform_11(%arg0: i32) -> (i32, i32, i32) {
    %c0_i32 = arith.constant 0 : i32
    %c0_i32_0 = arith.constant 0 : i32
    %c0_i32_1 = arith.constant 0 : i32
    return %arg0, %c0_i32, %c0_i32_0 : i32, i32, i32
  }
}

</mosaic_0001>

<bundles_post_ra>
// kernel: tpu_custom_call.1
= control target key start
LH: loop header
LB: loop body
LE: loop exit
PB: predicated region body
PF: predicated region fallthrough
CT: control target
= control target key end

     0   :  { %s2730_s0 = inlined_call_operand.hbm [shape: f32[2,8,32], index: 0, kind: input, shape index: {}]   ;;  %s2731_s1 = inlined_call_operand.hbm [shape: f32[2,8,32], index: 1, kind: input, shape index: {}]   ;;  %s2732_s2 = inlined_call_operand.hbm [shape: f32[2,8,32], index: 2, kind: input, shape index: {}]   ;;  %s2733_s3 = inlined_call_operand.hbm [shape: f32[32,32], index: 3, kind: input, shape index: {}]   ;;  %s2734_s4 = inlined_call_operand.vmem [shape: f32[1,32], index: 4, kind: input, shape index: {}]   ;;  %s2735_s5 = inlined_call_operand.hbm [shape: f32[32,32], index: 5, kind: input, shape index: {}]   ;;  %s2736_s6 = inlined_call_operand.vmem [shape: f32[1,32], index: 6, kind: input, shape index: {}]   ;;  %s2737_s7 = inlined_call_operand.hbm [shape: f32[32,32], index: 7, kind: input, shape index: {}]   ;;  %s2738_s8 = inlined_call_operand.vmem [shape: f32[1,32], index: 8, kind: input, shape index: {}]   ;;  %s2739_s9 = inlined_call_operand.hbm [shape: f32[32,32], index: 9, kind: input, shape index: {}]   ;;  %s2740_s10 = inlined_call_operand.vmem [shape: f32[1,32], index: 10, kind: input, shape index: {}]   ;;  %s2741_s11 = inlined_call_operand.hbm [shape: f32[2,8,32], index: 11, kind: output, shape index: {}]  }
   0x1   :  { %2762 = sst [smem:[#allocation25_spill]] %s2730_s0 }
   0x2   :  { %2763 = sst [smem:[#allocation26_spill]] %s2731_s1 }
   0x3   :  { %2764 = sst [smem:[#allocation27_spill]] %s2733_s3 }
   0x4   :  { %2765 = sst [smem:[#allocation28_spill]] %s2737_s7 }
   0x5   :  { %2766 = sst [smem:[#allocation29_spill]] %s2740_s10 }
   0x6   :  { %2767 = sst [smem:[#allocation30_spill]] %s2741_s11 }
   0x7   :  { %16 = vsyncpa [#allocation3], 0 }
   0x8   :  { %18 = vsyncpa [#allocation3 + $0x1], 0 }
   0x9   :  { %19 = vsyncpa [#allocation6], 0 }
   0xa   :  { %21 = vsyncpa [#allocation6 + $0x1], 0 }
   0xb   :  { %22 = vsyncpa [#allocation9], 0 }
   0xc   :  { %23 = vsyncpa [#allocation12], 0 }
   0xd   :  { %24 = vsyncpa [#allocation4], 0 }
   0xe   :  { %26 = vsyncpa [#allocation4 + $0x1], 0  ;;  %s2345_s17 = smov 0   ;;  %s2347_s18 = smov 0  }
   0xf   :  { %s2349_s19 = smov 0   ;;  %s2351_s20 = smov 0  }
  0x10 LB: > { %2768 = sst [smem:[#allocation20_spill]] %s2253_s17  ;;  %s2267_s21 = smov [#allocation8]   ;;  %s2265_s20 = sphi %s2351_s20, %s2805_s20   ;;  %s2261_s19 = sphi %s2349_s19, %s2809_s19   ;;  %s2257_s18 = sphi %s2347_s18, %s2808_s18   ;;  %s2253_s17 = sphi %s2345_s17, %s2807_s17  }
  0x11   : > { %2769 = sst [smem:[#allocation21_spill]] %s2265_s20  ;;  %s321_s22 = sshll.u32 %s2267_s21, 4  ;;  %s322_s22 = int_to_ptr.vmem [resolvable:$true] %s321_s22 }
  0x12   : > { %s2366_s23 = sadd.s32 4294967295, %s2265_s20   ;;  %p1713_p0 = scmp.ge.s32.totalorder %s2265_s20, 1 }
  0x13   : > { %p2754_p1 = scmp.eq.s32.totalorder %s2366_s23, 0  ;;  %p309_p2 = scmp.lt.s32.totalorder %s2265_s20, 3 }
  0x14   : > { %s2268_s25 = smov [#allocation11]   ;;  %s2012_s28 = scalar_lea.vmem %s322_s22, 512 }
  0x15   : > { %p2371_p3 = pnand %p1713_p0, %p309_p2  ;;  %s353_s26 = sshll.u32 %s2268_s25, 4  ;;  %s354_s26 = int_to_ptr.vmem [resolvable:$true] %s353_s26 }
  0x16   : > { %p2013_p8 = scmp.ne.s32.totalorder %s322_s22, %s2012_s28  ;;  %p2020_p11 = scmp.lt.s32.totalorder %s322_s22, %s322_s22 }
  0x17   : > { %s2770_s24 = scalar_select %p2371_p3, 1, 0 }
  0x18   : > { %p1902_p5 = pneg %p2371_p3  ;;  %p2021_p12 = scmp.lt.s32.totalorder %s2012_s28, %s2012_s28 }
  0x1a   : > { %p2380_p6 = pnand %p1902_p5, %p2754_p1  ;;  %p2022_p13 = por %p2021_p12, %p2020_p11 }
  0x1c   : > { %s2771_s27 = scalar_select %p2380_p6, 1, 0 }
  0x1d   : > { %p2742_p7 = pneg %p2380_p6 }
  0x1f   : > { %p2015_p9 = pnand %p2013_p8, %p2742_p7 }
  0x21   : > { %p2016_p10 = pneg %p2015_p9 }
  0x23   : > { %p2023_p0 = pnand %p2022_p13, %p2016_p10 }
  0x25   : > { %2026 = shalt.err (!%p2023_p0)
}
  0x26   : > { %s2743_s29 = smov 128   ;;  %s2745_s30 = smov 8  }
  0x27   : > { %s2772_s3 = sld [smem:[#allocation27_spill]]  ;;  %s2038_s14 = scalar_lea.vmem %s354_s26, 512 }
  0x28   : > { %p2039_p2 = scmp.ne.s32.totalorder %s354_s26, %s2038_s14  ;;  %p2046_p9 = scmp.lt.s32.totalorder %s354_s26, %s354_s26 }
  0x29   : > { %p2047_p10 = scmp.lt.s32.totalorder %s2038_s14, %s2038_s14 }
  0x2a   : > { %p2041_p5 = pnand %p2039_p2, %p2742_p7 }
  0x2b   : > { %p2048_p11 = por %p2047_p10, %p2046_p9 }
  0x2c   : > { %p2042_p8 = pneg %p2041_p5 }
  0x2d   : > { %1905 = dma.hbm_to_vmem [thread:$0]  (!%p2380_p6), %s2772_s3, 512, %s322_s22, [#allocation9], %s2743_s29, %s2743_s29, %s2745_s30  }
  0x2e   : > { %p2049_p12 = pnand %p2048_p11, %p2042_p8 }
  0x30   : > { %2052 = shalt.err (!%p2049_p12)
}
  0x31   : > { %s2773_s7 = sld [smem:[#allocation28_spill]]  ;;  %s1712_s21 = sadd.s32 4294967294, %s2265_s20  }
  0x32   : > { %s2410_s22 = sadd.s32 1, %s2265_s20   ;;  %s39_s28 = sadd.s32 1, %s2261_s19 }
  0x33   : > { %2774 = sst [smem:[#allocation22_spill]] %s2410_s22  ;;  %s36_s25 = ssub.s32 %s2265_s20, %s2410_s22 }
  0x34   : > { %p37_p13 = scmp.eq.s32.totalorder %s36_s25, 0  ;;  %p46_p0 = scmp.ne.s32.totalorder %s2261_s19, %s2257_s18 }
  0x35   : > { %p47_p2 = scmp.eq.s32.totalorder %s2265_s20, 0  ;;  %p52_p5 = scmp.ne.s32.totalorder %s2257_s18, %s2253_s17 }
  0x36   : > { %s2421_s12 = scalar_select %p37_p13, %s2261_s19, %s39_s28  }
  0x37   : > { %1911 = dma.hbm_to_vmem [thread:$0]  (!%p2380_p6), %s2773_s7, 512, %s354_s26, [#allocation12], %s2743_s29, %s2743_s29, %s2745_s30  }
  0x38   : > { %2775 = sst [smem:[#allocation23_spill]] %s2421_s12  ;;  %p48_p8 = por %p47_p2, %p46_p0 }
  0x39   : > { %p2425_p9 = por %p2754_p1, %p52_p5  ;;  %p296_p10 = scmp.eq.s32.totalorder %s2366_s23, 1 }
  0x3a   : > { %p302_p11 = scmp.eq.s32.totalorder %s1712_s21, 1  ;;  %p1933_p12 = scmp.lt.s32.totalorder %s2265_s20, 2 }
  0x3b   : > { %s2776_s13 = scalar_select %p2425_p9, 1, 0 }
  0x3c   : > { %s2747_s26 = sand.u32 1, %s2261_s19   ;;  %p2432_p4 = por %p296_p10, %p46_p0 }
  0x3d   : > { %p2436_p7 = por %p302_p11, %p52_p5  ;;  %s2442_s16 = sshll.u32 %s2747_s26, 3 }
  0x3e   : > { %s2777_s14 = scalar_select %p2432_p4, 1, 0 }
  0x3f   : > { %s2778_s15 = scalar_select %p2436_p7, 1, 0 }
  0x40   : > { %s2445_s25 = sshll.u32 %s2265_s20, 7  ;;  %p2447_p13 = pnand %p1933_p12, %p48_p8 }
  0x41   : > { %2779 = sst [smem:[#allocation24_spill]] %s2778_s15  ;;  %s404_s21 = sand.u32 1, %s2265_s20  }
  0x42   : > { %s2781_s1 = sld [smem:[#allocation26_spill]]  ;;  %s408_s26 = scalar_lea.vmem [#allocation5], %s2442_s16 }
  0x43   : > { %s415_s7 = sshll.u32 %s408_s26, 4  ;;  %s2271_s12 = smov [#allocation10]   ;;  %s2459_s7 = int_to_ptr.vmem [resolvable:$true] %s415_s7 }
  0x44   : > { %s337_s22 = sshll.u32 %s2271_s12, 4  ;;  %s2461_s15 = scalar_lea.sflag [#allocation6], %s404_s21  ;;  %s338_s22 = int_to_ptr.vmem [resolvable:$true] %s337_s22 }
  0x45   : > { %p2467_p2 = pneg %p2447_p13 }
  0x47   : > { %s2782_s20 = scalar_select %p2467_p2, 1, 0 }
  0x48   : > { %s2456_s3 = scalar_lea.hbm %s2781_s1, %s2445_s25  ;;  %s2058_s26 = scalar_lea.hbm %s2781_s1, 256 }
  0x49   : > { %s2053_s17 = scalar_lea.hbm %s2456_s3, 128  ;;  %p2059_p10 = scmp.lt.s32.totalorder %s2456_s3, %s2781_s1 }
  0x4a   : > { %p2054_p0 = scmp.ne.s32.totalorder %s2456_s3, %s2053_s17  ;;  %p2060_p11 = scmp.lt.s32.totalorder %s2058_s26, %s2053_s17 }
  0x4c   : > { %p2056_p5 = pnand %p2467_p2, %p2054_p0  ;;  %p2061_p12 = por %p2060_p11, %p2059_p10 }
  0x4e   : > { %p2057_p8 = pneg %p2056_p5 }
  0x50   : > { %p2062_p1 = pnand %p2061_p12, %p2057_p8 }
  0x52   : > { %2065 = shalt.err (!%p2062_p1)
}
  0x53   : > { %s2066_s12 = scalar_lea.vmem %s2459_s7, 128  ;;  %s2272_s21 = smov [#allocation5]  }
  0x54   : > { %p2067_p7 = scmp.ne.s32.totalorder %s2459_s7, %s2066_s12  ;;  %s2071_s29 = sshll.u32 %s2272_s21, 4  ;;  %s2072_s29 = int_to_ptr.vmem [resolvable:$false] %s2071_s29 }
  0x55   : > { %s2073_s30 = scalar_lea.vmem %s2072_s29, 256  ;;  %p2074_p4 = scmp.lt.s32.totalorder %s2459_s7, %s2072_s29 }
  0x56   : > { %p2069_p0 = pnand %p2067_p7, %p2467_p2  ;;  %p2075_p9 = scmp.lt.s32.totalorder %s2073_s30, %s2066_s12 }
  0x58   : > { %p2070_p5 = pneg %p2069_p0  ;;  %p2076_p3 = por %p2075_p9, %p2074_p4 }
  0x5a   : > { %p2077_p6 = pnand %p2076_p3, %p2070_p5 }
  0x5c   : > { %2080 = shalt.err (!%p2077_p6)
}
  0x5d   : > { %1921 = dma.hbm_to_vmem [thread:$0]  (!%p2447_p13), %s2456_s3, 128, %s2459_s7, %s2461_s15  }
  0x5e   : > { %s2092_s10 = scalar_lea.vmem %s338_s22, 512  ;;  %p2783_p7 = scmp.ne.s32.totalorder %s2771_s27, 0 }
  0x5f   : > { %p2093_p1 = scmp.ne.s32.totalorder %s338_s22, %s2092_s10  ;;  %p2100_p12 = scmp.lt.s32.totalorder %s338_s22, %s338_s22 }
  0x60   : > { %p2784_p8 = pneg %p2783_p7  ;;  %p2101_p0 = scmp.lt.s32.totalorder %s2092_s10, %s2092_s10 }
  0x62   : > { %p2095_p10 = pnand %p2093_p1, %p2784_p8  ;;  %p2102_p2 = por %p2101_p0, %p2100_p12 }
  0x64   : > { %p2096_p11 = pneg %p2095_p10 }
  0x66   : > { %p2103_p4 = pnand %p2102_p2, %p2096_p11 }
  0x68   : > { %2106 = shalt.err (!%p2103_p4)
}
  0x69   : > { %s2785_s11 = smov 8   ;;  %s2786_s17 = smov 128  }
  0x6a   : > { %1908 = dma.hbm_to_vmem [thread:$0]  (!%p2783_p7), %s2735_s5, 512, %s338_s22, [#allocation9], %s2786_s17, %s2786_s17, %s2785_s11  }
  0x6b   : > { %s2273_s3 = smov [#allocation13]   ;;  %p2787_p6 = pmov %p2784_p8 }
  0x6c   : > { %s369_s7 = sshll.u32 %s2273_s3, 4  ;;  %s370_s7 = int_to_ptr.vmem [resolvable:$true] %s369_s7 }
  0x6d   : > { %s2118_s21 = scalar_lea.vmem %s370_s7, 512  ;;  %p2126_p5 = scmp.lt.s32.totalorder %s370_s7, %s370_s7 }
  0x6e   : > { %p2119_p3 = scmp.ne.s32.totalorder %s370_s7, %s2118_s21  ;;  %p2127_p1 = scmp.lt.s32.totalorder %s2118_s21, %s2118_s21 }
  0x70   : > { %p2121_p9 = pnand %p2119_p3, %p2787_p6  ;;  %p2128_p8 = por %p2127_p1, %p2126_p5 }
  0x72   : > { %p2122_p2 = pneg %p2121_p9 }
  0x74   : > { %p2129_p10 = pnand %p2128_p8, %p2122_p2 }
  0x76   : > { %2132 = shalt.err (!%p2129_p10)
}
  0x77   : > { %1914 = dma.hbm_to_vmem [thread:$0]  (!%p2783_p7), %s2739_s9, 512, %s370_s7, [#allocation12], %s2786_s17, %s2786_s17, %s2785_s11  }
  0x78   : > { %s2788_s0 = sld [smem:[#allocation25_spill]]  ;;  %s390_s27 = scalar_lea.vmem [#allocation2], %s2442_s16 }
  0x79   : > { %s397_s12 = sshll.u32 %s390_s27, 4  ;;  %s2789_s3 = sand.u32 1, %s2261_s19   ;;  %s398_s12 = int_to_ptr.vmem [resolvable:$true] %s397_s12 }
  0x7a   : > { %s387_s21 = scalar_lea.sflag [#allocation3], %s2789_s3  ;;  %p2790_p12 = scmp.ne.s32.totalorder %s2782_s20, 0 }
  0x7e   : > { %s2516_s26 = scalar_lea.hbm %s2788_s0, %s2445_s25  ;;  %s2138_s17 = scalar_lea.hbm %s2788_s0, 256 }
  0x7f   : > { %s2133_s1 = scalar_lea.hbm %s2516_s26, 128  ;;  %p2139_p7 = scmp.lt.s32.totalorder %s2516_s26, %s2788_s0 }
  0x80   : > { %p2134_p11 = scmp.ne.s32.totalorder %s2516_s26, %s2133_s1  ;;  %p2140_p3 = scmp.lt.s32.totalorder %s2138_s17, %s2133_s1 }
  0x82   : > { %p2136_p0 = pnand %p2134_p11, %p2790_p12  ;;  %p2141_p6 = por %p2140_p3, %p2139_p7 }
  0x84   : > { %p2137_p4 = pneg %p2136_p0 }
  0x86   : > { %p2142_p9 = pnand %p2141_p6, %p2137_p4 }
  0x88   : > { %2145 = shalt.err (!%p2142_p9)
}
  0x89   : > { %s2146_s30 = scalar_lea.vmem %s398_s12, 128  ;;  %s2274_s10 = smov [#allocation2]  }
  0x8a   : > { %p2147_p2 = scmp.ne.s32.totalorder %s398_s12, %s2146_s30  ;;  %s2151_s27 = sshll.u32 %s2274_s10, 4  ;;  %s2152_s27 = int_to_ptr.vmem [resolvable:$false] %s2151_s27 }
  0x8b   : > { %s2153_s3 = scalar_lea.vmem %s2152_s27, 256  ;;  %p2154_p8 = scmp.lt.s32.totalorder %s398_s12, %s2152_s27 }
  0x8c   : > { %p2149_p5 = pnand %p2147_p2, %p2790_p12  ;;  %p2155_p10 = scmp.lt.s32.totalorder %s2153_s3, %s2146_s30 }
  0x8e   : > { %p2150_p1 = pneg %p2149_p5  ;;  %p2156_p11 = por %p2155_p10, %p2154_p8 }
  0x90   : > { %p2157_p0 = pnand %p2156_p11, %p2150_p1 }
  0x92   : > { %2160 = shalt.err (!%p2157_p0)
}
  0x93   : > { %1918 = dma.hbm_to_vmem [thread:$0]  (!%p2447_p13), %s2516_s26, 128, %s398_s12, %s387_s21  }
  0x94   : > { %s431_s11 = scalar_lea.hbm %s2732_s2, %s2445_s25  ;;  %s426_s17 = scalar_lea.vmem [#allocation7], %s2442_s16 }
  0x95   : > { %s433_s7 = sshll.u32 %s426_s17, 4  ;;  %s2161_s29 = scalar_lea.hbm %s431_s11, 128  ;;  %s434_s7 = int_to_ptr.vmem [resolvable:$true] %s433_s7 }
  0x96   : > { %p2162_p4 = scmp.ne.s32.totalorder %s431_s11, %s2161_s29  ;;  %s2166_s27 = scalar_lea.hbm %s2732_s2, 256 }
  0x97   : > { %p2167_p6 = scmp.lt.s32.totalorder %s431_s11, %s2732_s2  ;;  %p2168_p9 = scmp.lt.s32.totalorder %s2166_s27, %s2161_s29 }
  0x98   : > { %p2164_p7 = pnand %p2162_p4, %p2790_p12 }
  0x99   : > { %p2169_p2 = por %p2168_p9, %p2167_p6 }
  0x9a   : > { %p2165_p3 = pneg %p2164_p7 }
  0x9c   : > { %p2170_p5 = pnand %p2169_p2, %p2165_p3 }
  0x9e   : > { %2173 = shalt.err (!%p2170_p5)
}
  0x9f   : > { %s2174_s16 = scalar_lea.vmem %s434_s7, 128  ;;  %s2275_s25 = smov [#allocation7]  }
  0xa0   : > { %p2175_p1 = scmp.ne.s32.totalorder %s434_s7, %s2174_s16  ;;  %s2179_s26 = sshll.u32 %s2275_s25, 4  ;;  %s2180_s26 = int_to_ptr.vmem [resolvable:$false] %s2179_s26 }
  0xa1   : > { %s2181_s12 = scalar_lea.vmem %s2180_s26, 256  ;;  %p2182_p11 = scmp.lt.s32.totalorder %s434_s7, %s2180_s26 }
  0xa2   : > { %p2177_p8 = pnand %p2175_p1, %p2790_p12  ;;  %p2183_p0 = scmp.lt.s32.totalorder %s2181_s12, %s2174_s16 }
  0xa4   : > { %p2178_p10 = pneg %p2177_p8  ;;  %p2184_p4 = por %p2183_p0, %p2182_p11 }
  0xa6   : > { %p2185_p7 = pnand %p2184_p4, %p2178_p10 }
  0xa8   : > { %2188 = shalt.err (!%p2185_p7)
}
  0xa9   : > { %1924 = dma.hbm_to_vmem [thread:$0]  (!%p2447_p13), %s431_s11, 128, %s434_s7, %s2461_s15  }
  0xaa   : > { %p2791_p3 = scmp.ne.s32.totalorder %s2770_s24, 0 }
  0xab   : > { %s2558_s0 = sand.u32 (!%p2791_p3), 1, %s2257_s18   ;;  %p2792_p12 = scmp.ne.s32.totalorder (!%p2791_p3), %s2776_s13, 0 }
  0xac   : > { %442 = sbr.rel (%p2791_p3) target bundleno = 1627 (0x65b), region = 64  ;;  %s2561_s20 = sshll.u32 (!%p2791_p3), %s2558_s0, 3 }
  0xad   : > { %s445_s21 = scalar_lea.sflag (!%p2791_p3), [#allocation3], %s2558_s0  ;;  %s448_s1 = scalar_lea.vmem (!%p2791_p3), [#allocation2], %s2561_s20 }
  0xb1   : > { %2232 = dma.done.wait (%p2792_p12), %s445_s21, 128  }
  0xb2   : > { %2234 = vsyncadd (%p2792_p12), %s445_s21, 4294967168  ;;  %s453_s24 = sand.u32 1, %s2366_s23   ;;  %s457_s28 = scalar_lea.vmem [#allocation5], %s2561_s20 }
  0xb3   : > { %s454_s15 = scalar_lea.sflag [#allocation6], %s453_s24 }
  0xb4   : > { %2236 = dma.done.wait (%p2792_p12), %s454_s15, 256  }
  0xb5   : > { %2238 = vsyncadd (%p2792_p12), %s454_s15, 4294967040  ;;  %s466_s22 = scalar_lea.vmem [#allocation7], %s2561_s20  ;;  %p2793_p13 = scmp.eq.s32.totalorder %s2366_s23, 0 }
  0xb7   : > { %2240 = dma.done.wait (%p2793_p13), [#allocation9], 1024   ;;  %p2794_p6 = pmov %p2793_p13 }
  0xb9   : > { %2242 = vsyncadd (%p2794_p6), [#allocation9], 4294966272  ;;  %p2795_p9 = pmov %p2794_p6 }
  0xba   : > { %p2796_p2 = pmov %p2794_p6 }
  0xbb   : > { %2244 = dma.done.wait (%p2795_p9), [#allocation12], 1024  }
  0xbc   : > { %2246 = vsyncadd (%p2796_p2), [#allocation12], 4294966272  ;;  %v2276_v0 = vmov 0.0   ;;  %vm2277_vm0 = vmmov 0   ;;  %v537_v1 = vld [vmem:[#allocation8 + $0x18] sm:$0xff]  ;;  %v536_v3 = vld [vmem:[#allocation8 + $0x10] sm:$0xff] }
  0xbd   : > { %1794 = vmatprep.subr.mxu0 %v2276_v0  ;;  %1805 = vmatprep.subr.mxu1 %v2276_v0  ;;  %v622_v2 = vld [vmem:[#allocation10 + $0x18] sm:$0xff]  ;;  %v621_v4 = vld [vmem:[#allocation10 + $0x10] sm:$0xff]  ;;  %v535_v5 = vld [vmem:[#allocation8 + $0x8] sm:$0xff]  ;;  %vm545_vm1 = vcmask 261120   ;;  %vm788_vm2 = vcmask 64512   ;;  %s2278_s29 = smov 120  }
  0xbe   : > { %1802 = vmatprep.mubr.msk.f32.mxu0 %vm2277_vm0, %v2276_v0  ;;  %1813 = vmatprep.mubr.msk.f32.mxu1 %vm2277_vm0, %v2276_v0  ;;  %v620_v6 = vld [vmem:[#allocation10 + $0x8] sm:$0xff]  ;;  %v534_v7 = vld [vmem:[#allocation8] sm:$0xff]  ;;  %v531_v9 = vld [vmem:[%s448_s1] sm:$0xff]  ;;  %s2279_s30 = smov 112   ;;  %s2280_s10 = smov 104   ;;  %vm1458_vm3 = vcmask 130048  }
  0xbf   : > { %1795 = vmatpush3.msra.mxu0 %v537_v1  ;;  %1806 = vmatpush3.msra.mxu1 %v622_v2  ;;  %v619_v8 = vld [vmem:[#allocation10] sm:$0xff]  ;;  %v706_v11 = vld [vmem:[#allocation11 + $0x18] sm:$0xff]  ;;  %v705_v12 = vld [vmem:[#allocation11 + $0x10] sm:$0xff]  ;;  %s2281_s16 = smov 8   ;;  %s2282_s25 = smov 16   ;;  %vm1460_vm4 = vcmask 195584  }
  0xc0   : > { %1796 = vmatprep.subr.mxu0 %v2276_v0  ;;  %1807 = vmatprep.subr.mxu1 %v2276_v0  ;;  %v532_v10 = vld [vmem:[%s457_s28] sm:$0xff]  ;;  %v533_v15 = vld [vmem:[%s466_s22] sm:$0xff]  ;;  %s2283_s26 = smov 24   ;;  %s2797_s1 = sld [smem:[#allocation29_spill]] }
  0xc1   : > { %1797 = vmatpush3.msra.mxu0 %v536_v3  ;;  %1808 = vmatpush3.msra.mxu1 %v621_v4  ;;  %v704_v13 = vld [vmem:[#allocation11 + $0x8] sm:$0xff]  ;;  %v703_v14 = vld [vmem:[#allocation11] sm:$0xff]  ;;  %v1734_v16 = vld [vmem:[%s2734_s4] ss:$0 sm:$0xff]  ;;  %s1755_s24 = sshll.u32 %s2366_s23, 7  ;;  %s530_s15 = scalar_lea.vmem [#allocation14], %s2561_s20 }
  0xc2   : > { %1798 = vmatprep.subr.mxu0 %v2276_v0  ;;  %1809 = vmatprep.subr.mxu1 %v2276_v0  ;;  %v1736_v17 = vld [vmem:[%s2736_s6] ss:$0 sm:$0xff]  ;;  %s1561_s28 = sshll.u32 %s530_s15, 4  ;;  %s2798_s11 = sld [smem:[#allocation30_spill]]  ;;  %s1562_s28 = int_to_ptr.vmem [resolvable:$true] %s1561_s28 }
  0xc3   : > { %1799 = vmatpush3.msra.mxu0 %v535_v5  ;;  %1810 = vmatpush3.msra.mxu1 %v620_v6  ;;  %v1738_v30 = vld [vmem:[%s2738_s8] ss:$0 sm:$0xff]  ;;  %s1548_s7 = scalar_lea.sflag [#allocation4], %s2558_s0  ;;  %p2799_p1 = scmp.ne.s32.totalorder %s2777_s14, 0 }
  0xc4   : > { %1800 = vmatprep.subr.mxu0 %v2276_v0  ;;  %1811 = vmatprep.subr.mxu1 %v2276_v0  ;;  %s2284_s23 = smov [#allocation14]  }
  0xc5   : > { %1801 = vmatpush3.msra.mxu0 %v534_v7  ;;  %1812 = vmatpush3.msra.mxu1 %v619_v8  ;;  %s2193_s20 = sshll.u32 %s2284_s23, 4  ;;  %s2194_s20 = int_to_ptr.vmem [resolvable:$false] %s2193_s20 }
  0xc6   : > { %1803 = vmatmul.mubr.msk.f32.vlgmr.msra.gmra.mxu0 %vm545_vm1, %v531_v9  ;;  %1814 = vmatmul.mubr.msk.f32.vlgmr.msra.gmra.mxu1 %vm545_vm1, %v532_v10  ;;  %p2196_p11 = scmp.lt.s32.totalorder %s1562_s28, %s2194_s20 }
  0xc7   : > { %1827 = vmatprep.subr.mxu1 %v2276_v0  ;;  %1829 = vmatprep.mubr.msk.f32.mxu1 %vm2277_vm0, %v2276_v0 }
  0xc8   : > { %1816 = vmatprep.subr.mxu0 %v2276_v0  ;;  %1824 = vmatprep.mubr.msk.f32.mxu0 %vm2277_vm0, %v2276_v0  ;;  %s2692_s17 = scalar_lea.hbm %s2798_s11, %s1755_s24 }
  0xc9   : > { %1817 = vmatpush3.msra.mxu0 %v706_v11  ;;  %v1465_v11 = vld [vmem:[#allocation13 + $0x18] sm:$0xff] }
  0xca   : > { %1818 = vmatprep.subr.mxu0 %v2276_v0 }
  0xcb   : > { %1819 = vmatpush3.msra.mxu0 %v705_v12 }
  0xcc   : > { %1820 = vmatprep.subr.mxu0 %v2276_v0 }
  0xcd   : > { %1821 = vmatpush3.msra.mxu0 %v704_v13  ;;  %v1464_v13 = vld [vmem:[#allocation13 + $0x10] sm:$0xff] }
  0xce   : > { %1822 = vmatprep.subr.mxu0 %v2276_v0 }
  0xcf   : > { %1823 = vmatpush3.msra.mxu0 %v703_v14  ;;  %v1463_v14 = vld [vmem:[#allocation13 + $0x8] sm:$0xff] }
  0xd0   : > { %1847 = vmatprep.subr.mxu0 %v2276_v0  ;;  %1825 = vmatmul.mubr.msk.f32.vlgmr.msra.gmra.mxu0 %vm545_vm1, %v533_v15  ;;  %v1462_v15 = vld [vmem:[#allocation13] sm:$0xff] }
  0xd1   : > { %1849 = vmatprep.mubr.msk.f32.mxu0 %vm2277_vm0, %v2276_v0 }
 0x186   : > { %v615_v18 = vpop.f32.mrf.mxu0  ;;  %v699_v19 = vpop.f32.mrf.mxu1 }
 0x187   : > { %v616_v20 = vadd.f32 %v1734_v16, %v615_v18  ;;  %v700_v21 = vadd.f32 %v1736_v17, %v699_v19 }
 0x188   : > { %v1804_v22 = vpop.f32.mrf.mxu0  ;;  %v1815_v23 = vpop.f32.mrf.mxu1 }
 0x189   : > { %v787_v24 = vmul.f32 0.35355338, %v616_v20  ;;  %1828 = vmatpush3.xpose.msk.msra.mxu1 %vm788_vm2, %v700_v21 }
 0x18a   : > { %1832 = vmatprep.subr.mxu1 %v2276_v0 }
 0x18b   : > { %949 = vrot.lane.b32.xlu1 %v787_v24, %s2278_s29 }
 0x18c   : > { %1830 = vmatmul.mubr.msk.f32.vlgmr.msra.gmra.mxu1 %vm788_vm2, %v787_v24 }
 0x18d   : > { %1834 = vmatprep.mubr.msk.f32.mxu1 %vm2277_vm0, %v2276_v0 }
 0x18f   : > { %1117 = vrot.lane.b32.xlu1 %v700_v21, %s2279_s30 }
 0x190   : > { %v783_v31 = vpop.f32.mrf.mxu0 }
 0x191   : > { %v784_v32 = vadd.f32 %v1738_v30, %v783_v31 }
 0x192   : > { %v1826_v33 = vpop.f32.mrf.mxu0 }
 0x193   : > { %1115 = vrot.lane.b32.xlu1 %v787_v24, %s2279_s30  ;;  %1833 = vmatpush3.msra.mxu1 %v784_v32 }
 0x194   : > { %1837 = vmatprep.subr.mxu1 %v2276_v0 }
 0x197   : > { %1282 = vrot.lane.b32.xlu1 %v700_v21, %s2280_s10 }
 0x19b   : > { %1280 = vrot.lane.b32.xlu1 %v787_v24, %s2280_s10 }
 0x1fd   : > { %v950_v25 = vpop.permute.xlu1 %949 }
 0x201   : > { %v1118_v26 = vpop.permute.xlu1 %1117 }
 0x202   : > { %1848 = vmatpush3.xpose.msk.msra.mxu0 %vm788_vm2, %v1118_v26 }
 0x203   : > { %1857 = vmatprep.subr.mxu0 %v2276_v0 }
 0x205   : > { %v1116_v27 = vpop.permute.xlu1 %1115 }
 0x206   : > { %1850 = vmatmul.mubr.msk.f32.vlgmr.msra.gmra.mxu0 %vm788_vm2, %v1116_v27 }
 0x207   : > { %1859 = vmatprep.mubr.msk.f32.mxu0 %vm2277_vm0, %v2276_v0 }
 0x209   : > { %v1283_v28 = vpop.permute.xlu1 %1282 }
 0x20a   : > { %1858 = vmatpush3.xpose.msk.msra.mxu0 %vm788_vm2, %v1283_v28 }
 0x20b   : > { %1867 = vmatprep.subr.mxu0 %v2276_v0 }
 0x20d   : > { %v1281_v29 = vpop.permute.xlu1 %1280 }
 0x20e   : > { %1860 = vmatmul.mubr.msk.f32.vlgmr.msra.gmra.mxu0 %vm788_vm2, %v1281_v29 }
 0x20f   : > { %1875 = vmatprep.mubr.msk.f32.mxu0 %vm2277_vm0, %v2276_v0  ;;  %1868 = vmatpush3.msra.mxu0 %v1465_v11 }
 0x210   : > { %1869 = vmatprep.subr.mxu0 %v2276_v0 }
 0x211   : > { %1870 = vmatpush3.msra.mxu0 %v1464_v13 }
 0x212   : > { %1871 = vmatprep.subr.mxu0 %v2276_v0 }
 0x213   : > { %1872 = vmatpush3.msra.mxu0 %v1463_v14 }
 0x214   : > { %1873 = vmatprep.subr.mxu0 %v2276_v0 }
 0x215   : > { %1874 = vmatpush3.msra.mxu0 %v1462_v15 }
 0x24c   : > { %v861_v34 = vpop.f32.mrf.mxu1 }
 0x24d   : > { %v865_v35 = vsel %vm788_vm2, %v861_v34, -inf }
 0x24e   : > { %866 = vmax.xlane.f32.xlu0 %v865_v35  ;;  %v1831_v36 = vpop.f32.mrf.mxu1 }
 0x24f   : > { %v1752_v36 = vld [vmem:[%s2797_s1] ss:$0 sm:$0xff] }
 0x264   : > { %951 = vrot.lane.b32.xlu0 %v700_v21, %s2278_s29 }
 0x2c6   : > { %v1189_v37 = vpop.f32.mrf.mxu0 }
 0x2c7   : > { %v1193_v38 = vsel %vm788_vm2, %v1189_v37, -inf }
 0x2c8   : > { %1194 = vmax.xlane.f32.xlu0 %v1193_v38  ;;  %v1851_v39 = vpop.f32.mrf.mxu0 }
 0x2ce   : > { %v1354_v40 = vpop.f32.mrf.mxu0 }
 0x2cf   : > { %v1358_v41 = vsel %vm788_vm2, %v1354_v40, -inf }
 0x2d0   : > { %1359 = vmax.xlane.f32.xlu1 %v1358_v41  ;;  %v1861_v42 = vpop.f32.mrf.mxu0 }
 0x2d7   : > { %v867_v43 = vpop.xlane.xlu0 %866 }
 0x2d8   : > { %v868_v44 = vsub.f32 %v861_v34, %v867_v43 }
 0x2da   : > { %v869_v45 = vmul.f32 1.442695, %v868_v44 }
 0x2db   : > { %v952_v47 = vpop.permute.xlu0 %951 }
 0x2dc   : > { %1985 = vpow2.f32 %v869_v45 }
 0x2de   : > { %1037 = vrot.lane.b32.xlu0 %v784_v32, %s2278_s29  ;;  %s2189_s29 = scalar_lea.vmem %s1562_s28, 128 }
 0x2df   : > { %p2190_p5 = scmp.ne.s32.totalorder %s1562_s28, %s2189_s29 }
 0x2e1   : > { %p2191_p8 = pnand %p2190_p5, %p2799_p1 }
 0x2e3   : > { %p2192_p10 = pneg %p2191_p8 }
 0x2e9   : > { %v1986_v46 = vpop.eup %1985 }
 0x2ea   : > { %1835 = vmatmul.mubr.msk.f32.vlgmr.msra.gmra.mxu1 %vm788_vm2, %v1986_v46  ;;  %v871_v8 = vsel %vm788_vm2, %v1986_v46, 0.0 }
 0x2eb   : > { %1838 = vmatpush3.xpose.msk.msra.mxu1 %vm788_vm2, %v952_v47  ;;  %1839 = vmatprep.mubr.msk.f32.mxu1 %vm2277_vm0, %v2276_v0 }
 0x2ec   : > { %1842 = vmatprep.subr.mxu1 %v2276_v0 }
 0x2ee   : > { %1840 = vmatmul.mubr.msk.f32.vlgmr.msra.gmra.mxu1 %vm788_vm2, %v950_v25 }
 0x2ef   : > { %1844 = vmatprep.mubr.msk.f32.mxu1 %vm2277_vm0, %v2276_v0 }
 0x351   : > { %v1195_v48 = vpop.xlane.xlu0 %1194 }
 0x352   : > { %v1196_v55 = vsub.f32 %v1189_v37, %v1195_v48 }
 0x354   : > { %v1197_v56 = vmul.f32 1.442695, %v1196_v55 }
 0x355   : > { %v1038_v49 = vpop.permute.xlu0 %1037 }
 0x356   : > { %1843 = vmatpush3.msra.mxu1 %v1038_v49  ;;  %1987 = vpow2.f32 %v1197_v56 }
 0x357   : > { %1852 = vmatprep.subr.mxu1 %v2276_v0 }
 0x359   : > { %v1360_v59 = vpop.xlane.xlu1 %1359 }
 0x35a   : > { %v1361_v60 = vsub.f32 %v1354_v40, %v1360_v59 }
 0x35c   : > { %v1362_v63 = vmul.f32 1.442695, %v1361_v60 }
 0x363   : > { %v1988_v57 = vpop.eup %1987 }
 0x364   : > { %v1199_v58 = vsel %vm788_vm2, %v1988_v57, 0.0 }
 0x3aa   : > { %v2661_v50 = vpop.f32.mrf.mxu1 }
 0x3ac   : > { %v1836_v51 = vpop.f32.mrf.mxu1 }
 0x3ae   : > { %v1023_v52 = vpop.f32.mrf.mxu1 }
 0x3af   : > { %v1027_v53 = vsel %vm788_vm2, %v1023_v52, -inf }
 0x3b0   : > { %v1841_v54 = vpop.f32.mrf.mxu1  ;;  %1028 = vmax.xlane.f32.xlu1 %v1027_v53 }
 0x3c1   : > { %1202 = vrot.lane.b32.xlu1 %v784_v32, %s2279_s30  ;;  %s2195_s30 = scalar_lea.vmem %s2194_s20, 256 }
 0x3c2   : > { %p2197_p0 = scmp.lt.s32.totalorder %s2195_s30, %s2189_s29 }
 0x3c4   : > { %p2198_p4 = por %p2197_p0, %p2196_p11 }
 0x3c5   : > { %1367 = vrot.lane.b32.xlu1 %v784_v32, %s2280_s10 }
 0x3c6   : > { %p2199_p7 = pnand %p2198_p4, %p2192_p10 }
 0x3e9   : > { %1200 = vadd.xlane.f32.xlu1 %v1199_v58 }
 0x439   : > { %v1029_v61 = vpop.xlane.xlu1 %1028 }
 0x43a   : > { %v1030_v62 = vsub.f32 %v1023_v52, %v1029_v61 }
 0x43c   : > { %v1031_v1 = vmul.f32 1.442695, %v1030_v62 }
 0x43d   : > { %v1203_v2 = vpop.permute.xlu1 %1202 }
 0x43e   : > { %1989 = vpow2.f32 %v1031_v1 }
 0x43f   : > { %1991 = vpow2.f32 %v1362_v63 }
 0x441   : > { %v1368_v6 = vpop.permute.xlu1 %1367 }
 0x44b   : > { %v1990_v3 = vpop.eup %1989 }
 0x44c   : > { %1845 = vmatmul.mubr.msk.f32.vlgmr.msra.gmra.mxu1 %vm788_vm2, %v1990_v3  ;;  %v1033_v4 = vsel %vm788_vm2, %v1990_v3, 0.0  ;;  %v1992_v5 = vpop.eup %1991 }
 0x44d   : > { %1853 = vmatpush3.msra.mxu1 %v1203_v2  ;;  %1034 = vadd.xlane.f32.xlu0 %v1033_v4  ;;  %v1364_v7 = vsel %vm788_vm2, %v1992_v5, 0.0 }
 0x44e   : > { %1854 = vmatprep.mubr.msk.f32.mxu1 %vm2277_vm0, %v2276_v0  ;;  %1862 = vmatprep.subr.mxu1 %v2276_v0 }
 0x450   : > { %1855 = vmatmul.mubr.msk.f32.vlgmr.msra.gmra.mxu1 %vm788_vm2, %v1988_v57 }
 0x451   : > { %1863 = vmatpush3.msra.mxu1 %v1368_v6  ;;  %1365 = vadd.xlane.f32.xlu0 %v1364_v7 }
 0x452   : > { %1864 = vmatprep.mubr.msk.f32.mxu1 %vm2277_vm0, %v2276_v0 }
 0x454   : > { %1865 = vmatmul.mubr.msk.f32.vlgmr.msra.gmra.mxu1 %vm788_vm2, %v1992_v5 }
 0x455   : > { %872 = vadd.xlane.f32.xlu0 %v871_v8 }
 0x472   : > { %v1201_v10 = vpop.xlane.xlu1 %1200 }
 0x4d6   : > { %v1035_v9 = vpop.xlane.xlu0 %1034 }
 0x4d7   : > { %1993 = vrcp.f32 %v1035_v9 }
 0x4d8   : > { %1995 = vrcp.f32 %v1201_v10 }
 0x4da   : > { %v1366_v12 = vpop.xlane.xlu0 %1365 }
 0x4db   : > { %1997 = vrcp.f32 %v1366_v12 }
 0x4de   : > { %v873_v0 = vpop.xlane.xlu0 %872 }
 0x4df   : > { %1999 = vrcp.f32 %v873_v0 }
 0x4e4   : > { %v1994_v16 = vpop.eup %1993 }
 0x4e5   : > { %v1996_v20 = vpop.eup %1995 }
 0x4e8   : > { %v1998_v24 = vpop.eup %1997 }
 0x4ec   : > { %v2000_v28 = vpop.eup %1999 }
 0x4ed   : > { %v948_v30 = vmul.f32 %v2000_v28, %v2661_v50 }
 0x50c   : > { %v1109_v17 = vpop.f32.mrf.mxu1 }
 0x50d   : > { %v1114_v18 = vmul.f32 %v1994_v16, %v1109_v17 }
 0x50e   : > { %v1846_v19 = vpop.f32.mrf.mxu1 }
 0x50f   : > { %1446 = vrot.lane.b32.xlu1 %v1114_v18, %s2281_s16 }
 0x510   : > { %v1274_v21 = vpop.f32.mrf.mxu1 }
 0x511   : > { %v1279_v22 = vmul.f32 %v1996_v20, %v1274_v21 }
 0x512   : > { %v1856_v23 = vpop.f32.mrf.mxu1 }
 0x513   : > { %1450 = vrot.lane.b32.xlu0 %v1279_v22, %s2282_s25 }
 0x514   : > { %v1439_v25 = vpop.f32.mrf.mxu1 }
 0x515   : > { %v1444_v26 = vmul.f32 %v1998_v24, %v1439_v25 }
 0x516   : > { %v1866_v27 = vpop.f32.mrf.mxu1 }
 0x517   : > { %1454 = vrot.lane.b32.xlu1 %v1444_v26, %s2283_s26 }
 0x581   : > { %v1447_v29 = vpop.permute.xlu1 %1446 }
 0x582   : > { %v1457_v32 = vsel %vm788_vm2, %v948_v30, %v1447_v29 }
 0x585   : > { %v1451_v31 = vpop.permute.xlu0 %1450 }
 0x586   : > { %v1459_v33 = vsel %vm1458_vm3, %v1457_v32, %v1451_v31 }
 0x589   : > { %v1455_v34 = vpop.permute.xlu1 %1454 }
 0x58a   : > { %v1461_v35 = vsel %vm1460_vm4, %v1459_v33, %v1455_v34 }
 0x58b   : > { %1876 = vmatmul.mubr.msk.f32.vlgmr.msra.gmra.mxu0 %vm545_vm1, %v1461_v35 }
 0x64b   : > { %v1542_v37 = vpop.f32.mrf.mxu0 }
 0x64c   : > { %v1543_v38 = vadd.f32 %v1752_v36, %v1542_v37 }
 0x64d   : > { %v1877_v39 = vpop.f32.mrf.mxu0 }
 0x64e   : > { %1546 = vst.msk [vmem:[%s530_s15] sm:$0xff] %vm545_vm1, %v1543_v38 }
 0x64f   : > { %2202 = shalt.err (!%p2199_p7)
}
 0x650   : > { %s2203_s10 = scalar_lea.hbm %s2692_s17, 128  ;;  %s2207_s3 = scalar_lea.hbm %s2798_s11, 256 }
 0x651   : > { %p2204_p3 = scmp.ne.s32.totalorder %s2692_s17, %s2203_s10  ;;  %p2208_p6 = scmp.lt.s32.totalorder %s2692_s17, %s2798_s11 }
 0x652   : > { %p2209_p9 = scmp.lt.s32.totalorder %s2207_s3, %s2203_s10 }
 0x653   : > { %p2205_p12 = pnand %p2204_p3, %p2799_p1 }
 0x654   : > { %p2210_p2 = por %p2209_p9, %p2208_p6 }
 0x655   : > { %p2206_p13 = pneg %p2205_p12 }
 0x657   : > { %p2211_p5 = pnand %p2210_p2, %p2206_p13 }
 0x659   : > { %2214 = shalt.err (!%p2211_p5)
}
 0x65a   : > { %1900 = dma.vmem_to_hbm [thread:$0]  (%p2799_p1), %s1562_s28, 128, %s2692_s17, %s1548_s7  }
 0x65b PF: > { %s2800_s26 = sld [smem:[#allocation20_spill]] }
 0x65c   : > { %s2801_s12 = sld [smem:[#allocation24_spill]] }
 0x65d   : > { %s2802_s21 = sld [smem:[#allocation21_spill]] }
 0x661   : > { %s1573_s1 = sand.u32 1, %s2800_s26  }
 0x662   : > { %p2803_p8 = scmp.ne.s32.totalorder %s2801_s12, 0  ;;  %s1574_s24 = scalar_lea.sflag [#allocation4], %s1573_s1 }
 0x663   : > { %p2804_p10 = scmp.ge.s32.totalorder %s2802_s21, 2 }
 0x665   : > { %p1926_p11 = pnand %p2804_p10, %p2803_p8 }
 0x667   : > { %p1927_p0 = pneg %p1926_p11 }
 0x669   : > { %2248 = dma.done.wait (%p1927_p0), %s1574_s24, 128  }
 0x66a   : > { %2250 = vsyncadd (%p1927_p0), %s1574_s24, 4294967168  ;;  %s2805_s20 = sld [smem:[#allocation22_spill]]  ;;  %s2807_s17 = smov %s2257_s18 }
 0x66b   : > { %s2806_s15 = sld [smem:[#allocation23_spill]]  ;;  %s2808_s18 = smov %s2261_s19 }
 0x670   : > { %p29_p4 = scmp.ge.s32.totalorder %s2805_s20, 4  }
 0x671   : > { %s2809_s19 = smov %s2806_s15 }
 0x672   :  { %31 = sbr.rel (!%p29_p4) target bundleno = 16 (0x10), region = 149 }
 0x677   :  { %1579 = vsyncpa [#allocation3], 1 }
 0x678   :  { %1581 = vsyncpa [#allocation3 + $0x1], 1 }
 0x679   :  { %1582 = vsyncpa [#allocation6], 1 }
 0x67a   :  { %1584 = vsyncpa [#allocation6 + $0x1], 1 }
 0x67b   :  { %1585 = vsyncpa [#allocation9], 1 }
 0x67c   :  { %1586 = vsyncpa [#allocation12], 1 }
 0x67d   :  { %1587 = vsyncpa [#allocation4], 1 }
 0x67e   :  { %1589 = vsyncpa [#allocation4 + $0x1], 1 }

</bundles_post_ra>
